<compile_context>
chip_gen: v7x
topology: tpu7x:2x2x1
jax: 0.10.0
libtpu: 0.0.40
codegen_flags: <defaults>
</compile_context>

<pallas_src>
import jax
import jax.numpy as jnp
from jax.experimental import pallas as pl
from jax.experimental.pallas import tpu as pltpu

_NEG = -1e30  # bias for padded class columns: exp underflows to exactly 0


def _round_up(x, m):
    return ((x + m - 1) // m) * m


def _pad2(a, rows, cols, fill=0.0):
    r, c = a.shape
    return jnp.pad(a, ((0, rows - r), (0, cols - c)), constant_values=fill)


def _dot_split_bf16(a_bf16, x_f32):
    """Error-compensated bf16 matmul of an exact-0/1 bf16 matrix with f32 x.

    Two bf16 MXU passes with f32 accumulation reproduce the f32 result to
    ~2^-16 relative, avoiding the 3+-pass f32 MXU decomposition and any
    resident f32 copy of the (dominant) 0/1 matrix.
    """
    x_hi = x_f32.astype(jnp.bfloat16)
    x_lo = (x_f32 - x_hi.astype(jnp.float32)).astype(jnp.bfloat16)
    out = jnp.dot(a_bf16, x_hi, preferred_element_type=jnp.float32)
    return out + jnp.dot(a_bf16, x_lo, preferred_element_type=jnp.float32)


def gnn_kernel(adj_ref, x_ref, pool_ref,
               w1_ref, b1_ref, w2_ref, b2_ref,
               w3_ref, b3_ref, w4_ref, b4_ref,
               out_ref):
    adj = adj_ref[...]          # bf16 (exact 0/1), never upcast
    x = x_ref[...]              # f32 [Np, Fp]

    # layer 1: (A + I) @ x == A @ x + x  (identity never materialized)
    x = _dot_split_bf16(adj, x) + x
    x = jnp.dot(x, w1_ref[...], preferred_element_type=jnp.float32) + b1_ref[...]
    x = jnp.maximum(x, 0.0)

    # layer 2: (A + I) @ x == A @ x + x
    x = _dot_split_bf16(adj, x) + x
    x = jnp.dot(x, w2_ref[...], preferred_element_type=jnp.float32) + b2_ref[...]
    x = jnp.maximum(x, 0.0)

    # scatter_add_ sum-pooling: one-hot [Gp, Np] bf16 matmul on the MXU
    pooled = _dot_split_bf16(pool_ref[...], x)

    # MLP head -- all elementwise work stays f32 (v5e VPU/EUP have no bf16)
    h = jnp.dot(pooled, w3_ref[...], preferred_element_type=jnp.float32) + b3_ref[...]
    h = jnp.maximum(h, 0.0)
    logits = jnp.dot(h, w4_ref[...], preferred_element_type=jnp.float32) + b4_ref[...]

    # log_softmax over the lane axis; padded class columns sit at ~-1e30 so
    # their exp underflows to 0 and the reduction is exact for real classes.
    m = jnp.max(logits, axis=1, keepdims=True)
    z = logits - m
    lse = jnp.log(jnp.sum(jnp.exp(z), axis=1, keepdims=True))
    out_ref[...] = z - lse


def gnn_forward(x_in, adj, idx, params, num_graphs):
    """params: dict with w1..w4 ([in,out]) and b1..b4 ([1,out])."""
    N, F = x_in.shape
    H1 = params["w1"].shape[1]
    H2 = params["w2"].shape[1]
    H3 = params["w3"].shape[1]
    C = params["w4"].shape[1]

    # Lane-dense padded sizes: feature & node axes -> multiples of 128 (vreg
    # lane / MXU width, unmasked stores), graph axis -> multiple of 8 sublanes.
    Np = _round_up(N, 128)
    Fp, H1p, H2p, H3p, Cp = (_round_up(d, 128) for d in (F, H1, H2, H3, C))
    Gp = _round_up(num_graphs, 8)

    x_p = _pad2(x_in.astype(jnp.float32), Np, Fp)
    # 0/1 adjacency is exact in bf16 -> half the HBM->VMEM bytes of the
    # dominant array.  (Weighted adjacencies must NOT take this path.)
    adj_p = _pad2(adj.astype(jnp.float32), Np, Np).astype(jnp.bfloat16)

    # One-hot pooling matrix built once outside the kernel (0/1 -> exact bf16).
    idx_p = jnp.full((Np,), -1, jnp.int32).at[:N].set(idx.astype(jnp.int32))
    gids = jnp.arange(Gp, dtype=jnp.int32)[:, None]               # [Gp, 1]
    pool = (gids == idx_p[None, :]).astype(jnp.bfloat16)          # [Gp, Np]

    w1 = _pad2(params["w1"], Fp, H1p);   b1 = _pad2(params["b1"], 1, H1p)
    w2 = _pad2(params["w2"], H1p, H2p);  b2 = _pad2(params["b2"], 1, H2p)
    w3 = _pad2(params["w3"], H2p, H3p);  b3 = _pad2(params["b3"], 1, H3p)
    w4 = _pad2(params["w4"], H3p, Cp);   b4 = _pad2(params["b4"], 1, Cp, fill=_NEG)

    args = (adj_p, x_p, pool, w1, b1, w2, b2, w3, b3, w4, b4)

    def _nbytes(a):
        return int(a.size) * jnp.dtype(a.dtype).itemsize

    in_bytes = sum(_nbytes(a) for a in args)
    out_bytes = Gp * Cp * 4

    # VMEM budget: operands + f32 activation working set (plus bf16 hi/lo
    # splits), 2x headroom, capped generation-aware at ~87% of physical VMEM.
    max_w = max(Fp, H1p, H2p)
    est = in_bytes + out_bytes + 6 * Np * max_w * 4
    try:
        phys_vmem = int(getattr(pltpu.get_tpu_info(), "vmem_capacity_bytes",
                                64 << 20))
    except Exception:
        phys_vmem = 64 << 20
    vmem_limit = int(min(max(2 * est, 16 << 20), (phys_vmem * 7) // 8))

    # Advisory scheduling hint for XLA (bf16-split aggregation = 2 passes each).
    flops = (2 * (2 * Np * Np * Fp) + 2 * Np * Fp * H1p
             + 2 * (2 * Np * Np * H1p) + 2 * Np * H1p * H2p
             + 2 * (2 * Gp * Np * H2p) + 2 * Gp * H2p * H3p
             + 2 * Gp * H3p * Cp)
    try:
        cost = pl.CostEstimate(flops=flops,
                               transcendentals=Gp * Cp + Gp,
                               bytes_accessed=in_bytes + out_bytes)
    except Exception:
        cost = None

    vmem = pl.BlockSpec(memory_space=pltpu.MemorySpace.VMEM)
    out_p = pl.pallas_call(
        gnn_kernel,
        out_shape=jax.ShapeDtypeStruct((Gp, Cp), jnp.float32),
        in_specs=[vmem] * len(args),
        out_specs=vmem,
        compiler_params=pltpu.CompilerParams(vmem_limit_bytes=vmem_limit),
        cost_estimate=cost,
    )(*args)

    return out_p[:num_graphs, :C]


def init_params(key, input_dim, h1, h2, h3, n_class):
    """Deterministic PyTorch-style init: U(-1/sqrt(fan_in), 1/sqrt(fan_in))."""
    dims = [(input_dim, h1), (h1, h2), (h2, h3), (h3, n_class)]
    params = {}
    for i, (fin, fout) in enumerate(dims, start=1):
        key, kw, kb = jax.random.split(key, 3)
        bound = 1.0 / (fin ** 0.5)
        # Stored transposed relative to PyTorch: [in, out] so y = x @ W + b.
        params[f"w{i}"] = jax.random.uniform(kw, (fin, fout), jnp.float32, -bound, bound)
        params[f"b{i}"] = jax.random.uniform(kb, (1, fout), jnp.float32, -bound, bound)
    return params


if __name__ == "__main__":
    # Small shapes consistent with the module's forward.
    N, input_dim = 32, 16          # nodes, node feature dim
    h1, h2, h3, n_class = 32, 32, 32, 8
    G = 4                          # number of graphs = max(idx)+1

    key = jax.random.PRNGKey(0)
    k_x, k_adj, k_p = jax.random.split(key, 3)

    x_in = jax.random.normal(k_x, (N, input_dim), jnp.float32)
    adj = (jax.random.uniform(k_adj, (N, N)) < 0.2).astype(jnp.float32)
    adj = jnp.maximum(adj, adj.T)                     # symmetric 0/1 adjacency
    idx = jnp.arange(N, dtype=jnp.int32) % G          # ensures max(idx)+1 == G

    params = init_params(k_p, input_dim, h1, h2, h3, n_class)

    out = gnn_forward(x_in, adj, idx, params, num_graphs=G)
    jax.block_until_ready(out)

    # Pure-JAX reference for a sanity check.
    def ref(x_in, adj, idx, p):
        adj_hat = adj + jnp.eye(adj.shape[0], dtype=adj.dtype)
        x = adj_hat @ x_in
        x = jax.nn.relu(x @ p["w1"] + p["b1"])
        x = adj_hat @ x
        x = jax.nn.relu(x @ p["w2"] + p["b2"])
        pooled = jax.ops.segment_sum(x, idx, num_segments=G)
        h = jax.nn.relu(pooled @ p["w3"] + p["b3"])
        logits = h @ p["w4"] + p["b4"]
        return jax.nn.log_softmax(logits, axis=1)

    expected = ref(x_in, adj, idx, params)
    assert out.shape == (G, n_class)
    assert jnp.allclose(out, expected, atol=1e-4, rtol=1e-4)
    print("KERNEL_OK")
</pallas_src>

<mosaic_0001>
module attributes {stable_mosaic.version = 11 : i64} {
  func.func @gnn_kernel(%arg0: memref<128x128xbf16, #tpu.memory_space<vmem>>, %arg1: memref<128x128xf32, #tpu.memory_space<vmem>>, %arg2: memref<8x128xbf16, #tpu.memory_space<vmem>>, %arg3: memref<128x128xf32, #tpu.memory_space<vmem>>, %arg4: memref<1x128xf32, #tpu.memory_space<vmem>>, %arg5: memref<128x128xf32, #tpu.memory_space<vmem>>, %arg6: memref<1x128xf32, #tpu.memory_space<vmem>>, %arg7: memref<128x128xf32, #tpu.memory_space<vmem>>, %arg8: memref<1x128xf32, #tpu.memory_space<vmem>>, %arg9: memref<128x128xf32, #tpu.memory_space<vmem>>, %arg10: memref<1x128xf32, #tpu.memory_space<vmem>>, %arg11: memref<8x128xf32, #tpu.memory_space<vmem>>) attributes {dimension_semantics = [], scalar_prefetch = 0 : i64, scratch_operands = 0 : i64, tpu.core_type = #tpu.core_type<tc>} {
    %c0 = arith.constant 0 : index
    %c0_0 = arith.constant 0 : index
    %0 = vector.load %arg0[%c0, %c0_0] : memref<128x128xbf16, #tpu.memory_space<vmem>>, vector<128x128xbf16>
    %c0_1 = arith.constant 0 : index
    %c0_2 = arith.constant 0 : index
    %1 = vector.load %arg1[%c0_1, %c0_2] : memref<128x128xf32, #tpu.memory_space<vmem>>, vector<128x128xf32>
    %2 = arith.truncf %1 : vector<128x128xf32> to vector<128x128xbf16>
    %3 = arith.extf %2 : vector<128x128xbf16> to vector<128x128xf32>
    %4 = arith.subf %1, %3 : vector<128x128xf32>
    %5 = arith.truncf %4 : vector<128x128xf32> to vector<128x128xbf16>
    %cst = arith.constant dense<0.000000e+00> : vector<128x128xf32>
    %6 = tpu.matmul %0, %2, %cst {dimension_numbers = #tpu.dot_dimension_numbers<[1], [0], [0], [1], [0, 0, 1, 1], [], []>} : vector<128x128xbf16>, vector<128x128xbf16>, vector<128x128xf32> -> vector<128x128xf32>
    %cst_3 = arith.constant dense<0.000000e+00> : vector<128x128xf32>
    %7 = tpu.matmul %0, %5, %cst_3 {dimension_numbers = #tpu.dot_dimension_numbers<[1], [0], [0], [1], [0, 0, 1, 1], [], []>} : vector<128x128xbf16>, vector<128x128xbf16>, vector<128x128xf32> -> vector<128x128xf32>
    %8 = arith.addf %6, %7 : vector<128x128xf32>
    %9 = arith.addf %8, %1 : vector<128x128xf32>
    %c0_4 = arith.constant 0 : index
    %c0_5 = arith.constant 0 : index
    %10 = vector.load %arg3[%c0_4, %c0_5] : memref<128x128xf32, #tpu.memory_space<vmem>>, vector<128x128xf32>
    %cst_6 = arith.constant dense<0.000000e+00> : vector<128x128xf32>
    %11 = tpu.matmul %9, %10, %cst_6 {dimension_numbers = #tpu.dot_dimension_numbers<[1], [0], [0], [1], [0, 0, 1, 1], [], []>} : vector<128x128xf32>, vector<128x128xf32>, vector<128x128xf32> -> vector<128x128xf32>
    %c0_7 = arith.constant 0 : index
    %c0_8 = arith.constant 0 : index
    %12 = vector.load %arg4[%c0_7, %c0_8] : memref<1x128xf32, #tpu.memory_space<vmem>>, vector<1x128xf32>
    %13 = vector.broadcast %12 : vector<1x128xf32> to vector<128x128xf32>
    %14 = arith.addf %11, %13 : vector<128x128xf32>
    %cst_9 = arith.constant 0.000000e+00 : f32
    %15 = vector.broadcast %cst_9 : f32 to vector<128x128xf32>
    %16 = arith.maximumf %14, %15 : vector<128x128xf32>
    %17 = arith.truncf %16 : vector<128x128xf32> to vector<128x128xbf16>
    %18 = arith.extf %17 : vector<128x128xbf16> to vector<128x128xf32>
    %19 = arith.subf %16, %18 : vector<128x128xf32>
    %20 = arith.truncf %19 : vector<128x128xf32> to vector<128x128xbf16>
    %cst_10 = arith.constant dense<0.000000e+00> : vector<128x128xf32>
    %21 = tpu.matmul %0, %17, %cst_10 {dimension_numbers = #tpu.dot_dimension_numbers<[1], [0], [0], [1], [0, 0, 1, 1], [], []>} : vector<128x128xbf16>, vector<128x128xbf16>, vector<128x128xf32> -> vector<128x128xf32>
    %cst_11 = arith.constant dense<0.000000e+00> : vector<128x128xf32>
    %22 = tpu.matmul %0, %20, %cst_11 {dimension_numbers = #tpu.dot_dimension_numbers<[1], [0], [0], [1], [0, 0, 1, 1], [], []>} : vector<128x128xbf16>, vector<128x128xbf16>, vector<128x128xf32> -> vector<128x128xf32>
    %23 = arith.addf %21, %22 : vector<128x128xf32>
    %24 = arith.addf %23, %16 : vector<128x128xf32>
    %c0_12 = arith.constant 0 : index
    %c0_13 = arith.constant 0 : index
    %25 = vector.load %arg5[%c0_12, %c0_13] : memref<128x128xf32, #tpu.memory_space<vmem>>, vector<128x128xf32>
    %cst_14 = arith.constant dense<0.000000e+00> : vector<128x128xf32>
    %26 = tpu.matmul %24, %25, %cst_14 {dimension_numbers = #tpu.dot_dimension_numbers<[1], [0], [0], [1], [0, 0, 1, 1], [], []>} : vector<128x128xf32>, vector<128x128xf32>, vector<128x128xf32> -> vector<128x128xf32>
    %c0_15 = arith.constant 0 : index
    %c0_16 = arith.constant 0 : index
    %27 = vector.load %arg6[%c0_15, %c0_16] : memref<1x128xf32, #tpu.memory_space<vmem>>, vector<1x128xf32>
    %28 = vector.broadcast %27 : vector<1x128xf32> to vector<128x128xf32>
    %29 = arith.addf %26, %28 : vector<128x128xf32>
    %cst_17 = arith.constant 0.000000e+00 : f32
    %30 = vector.broadcast %cst_17 : f32 to vector<128x128xf32>
    %31 = arith.maximumf %29, %30 : vector<128x128xf32>
    %c0_18 = arith.constant 0 : index
    %c0_19 = arith.constant 0 : index
    %32 = vector.load %arg2[%c0_18, %c0_19] : memref<8x128xbf16, #tpu.memory_space<vmem>>, vector<8x128xbf16>
    %33 = arith.truncf %31 : vector<128x128xf32> to vector<128x128xbf16>
    %34 = arith.extf %33 : vector<128x128xbf16> to vector<128x128xf32>
    %35 = arith.subf %31, %34 : vector<128x128xf32>
    %36 = arith.truncf %35 : vector<128x128xf32> to vector<128x128xbf16>
    %cst_20 = arith.constant dense<0.000000e+00> : vector<8x128xf32>
    %37 = tpu.matmul %32, %33, %cst_20 {dimension_numbers = #tpu.dot_dimension_numbers<[1], [0], [0], [1], [0, 0, 1, 1], [], []>} : vector<8x128xbf16>, vector<128x128xbf16>, vector<8x128xf32> -> vector<8x128xf32>
    %cst_21 = arith.constant dense<0.000000e+00> : vector<8x128xf32>
    %38 = tpu.matmul %32, %36, %cst_21 {dimension_numbers = #tpu.dot_dimension_numbers<[1], [0], [0], [1], [0, 0, 1, 1], [], []>} : vector<8x128xbf16>, vector<128x128xbf16>, vector<8x128xf32> -> vector<8x128xf32>
    %39 = arith.addf %37, %38 : vector<8x128xf32>
    %c0_22 = arith.constant 0 : index
    %c0_23 = arith.constant 0 : index
    %40 = vector.load %arg7[%c0_22, %c0_23] : memref<128x128xf32, #tpu.memory_space<vmem>>, vector<128x128xf32>
    %cst_24 = arith.constant dense<0.000000e+00> : vector<8x128xf32>
    %41 = tpu.matmul %39, %40, %cst_24 {dimension_numbers = #tpu.dot_dimension_numbers<[1], [0], [0], [1], [0, 0, 1, 1], [], []>} : vector<8x128xf32>, vector<128x128xf32>, vector<8x128xf32> -> vector<8x128xf32>
    %c0_25 = arith.constant 0 : index
    %c0_26 = arith.constant 0 : index
    %42 = vector.load %arg8[%c0_25, %c0_26] : memref<1x128xf32, #tpu.memory_space<vmem>>, vector<1x128xf32>
    %43 = vector.broadcast %42 : vector<1x128xf32> to vector<8x128xf32>
    %44 = arith.addf %41, %43 : vector<8x128xf32>
    %cst_27 = arith.constant 0.000000e+00 : f32
    %45 = vector.broadcast %cst_27 : f32 to vector<8x128xf32>
    %46 = arith.maximumf %44, %45 : vector<8x128xf32>
    %c0_28 = arith.constant 0 : index
    %c0_29 = arith.constant 0 : index
    %47 = vector.load %arg9[%c0_28, %c0_29] : memref<128x128xf32, #tpu.memory_space<vmem>>, vector<128x128xf32>
    %cst_30 = arith.constant dense<0.000000e+00> : vector<8x128xf32>
    %48 = tpu.matmul %46, %47, %cst_30 {dimension_numbers = #tpu.dot_dimension_numbers<[1], [0], [0], [1], [0, 0, 1, 1], [], []>} : vector<8x128xf32>, vector<128x128xf32>, vector<8x128xf32> -> vector<8x128xf32>
    %c0_31 = arith.constant 0 : index
    %c0_32 = arith.constant 0 : index
    %49 = vector.load %arg10[%c0_31, %c0_32] : memref<1x128xf32, #tpu.memory_space<vmem>>, vector<1x128xf32>
    %50 = vector.broadcast %49 : vector<1x128xf32> to vector<8x128xf32>
    %51 = arith.addf %48, %50 : vector<8x128xf32>
    %cst_33 = arith.constant dense<0xFF800000> : vector<8xf32>
    %52 = vector.multi_reduction <maximumf>, %51, %cst_33 [1] : vector<8x128xf32> to vector<8xf32>
    %53 = vector.shape_cast %52 : vector<8xf32> to vector<8x1xf32>
    %54 = vector.broadcast %53 : vector<8x1xf32> to vector<8x128xf32>
    %55 = arith.subf %51, %54 : vector<8x128xf32>
    %56 = math.exp %55 : vector<8x128xf32>
    %cst_34 = arith.constant dense<0.000000e+00> : vector<8xf32>
    %57 = vector.multi_reduction <add>, %56, %cst_34 [1] : vector<8x128xf32> to vector<8xf32>
    %58 = vector.shape_cast %57 : vector<8xf32> to vector<8x1xf32>
    %59 = math.log %58 : vector<8x1xf32>
    %60 = vector.broadcast %59 : vector<8x1xf32> to vector<8x128xf32>
    %61 = arith.subf %55, %60 : vector<8x128xf32>
    %c0_35 = arith.constant 0 : index
    %c0_36 = arith.constant 0 : index
    %62 = vector.load %arg11[%c0_35, %c0_36] : memref<8x128xf32, #tpu.memory_space<vmem>>, vector<8x128xf32>
    tpu.vector_store %arg11[%c0_35, %c0_36], %61 {strides = array<i32>} : memref<8x128xf32, #tpu.memory_space<vmem>>, vector<8x128xf32>,
    return
  }
}

</mosaic_0001>

<bundles_post_ra>
// kernel: tpu_custom_call.1
= control target key start
LH: loop header
LB: loop body
LE: loop exit
PB: predicated region body
PF: predicated region fallthrough
CT: control target
= control target key end

     0   :  { %16 = vsyncpa [#allocation3], 0  ;;  %s2881_s0 = inlined_call_operand.hbm [shape: bf16[128,128], index: 0, kind: input, shape index: {}]   ;;  %s2882_s1 = inlined_call_operand.hbm [shape: f32[128,128], index: 1, kind: input, shape index: {}]   ;;  %s2883_s2 = inlined_call_operand.vmem [shape: bf16[8,128], index: 2, kind: input, shape index: {}]   ;;  %s2884_s3 = inlined_call_operand.hbm [shape: f32[128,128], index: 3, kind: input, shape index: {}]   ;;  %s2885_s4 = inlined_call_operand.vmem [shape: f32[1,128], index: 4, kind: input, shape index: {}]   ;;  %s2886_s5 = inlined_call_operand.hbm [shape: f32[128,128], index: 5, kind: input, shape index: {}]   ;;  %s2887_s6 = inlined_call_operand.vmem [shape: f32[1,128], index: 6, kind: input, shape index: {}]   ;;  %s2888_s7 = inlined_call_operand.hbm [shape: f32[128,128], index: 7, kind: input, shape index: {}]   ;;  %s2889_s8 = inlined_call_operand.vmem [shape: f32[1,128], index: 8, kind: input, shape index: {}]   ;;  %s2890_s9 = inlined_call_operand.hbm [shape: f32[128,128], index: 9, kind: input, shape index: {}]   ;;  %s2891_s10 = inlined_call_operand.vmem [shape: f32[1,128], index: 10, kind: input, shape index: {}]   ;;  %s2892_s11 = inlined_call_operand.hbm [shape: f32[8,128], index: 11, kind: output, shape index: {}]  }
   0x1   :  { %17 = vsyncpa [#allocation6], 0 }
   0x2   :  { %18 = vsyncpa [#allocation9], 0 }
   0x3   :  { %19 = vsyncpa [#allocation12], 0 }
   0x4   :  { %20 = vsyncpa [#allocation4], 0  ;;  %s2311_s17 = smov [#allocation5]   ;;  %s2147_s21 = scalar_lea.hbm %s2882_s1, 2048 }
   0x5   :  { %s38_s18 = sshll.u32 %s2311_s17, 4  ;;  %p2148_p0 = scmp.ne.s32.totalorder %s2882_s1, %s2147_s21  ;;  %s39_s18 = int_to_ptr.vmem [resolvable:$true] %s38_s18 }
   0x6   :  { %p2151_p1 = scmp.lt.u32.totalorder %s2147_s21, %s2882_s1 }
   0x8   :  { %p2153_p2 = pnand %p2151_p1, %p2148_p0 }
   0xa   :  { %2156 = shalt.err (!%p2153_p2)
}
   0xb   :  { %s2157_s26 = scalar_lea.vmem %s39_s18, 2048  ;;  %p2162_p4 = scmp.lt.s32.totalorder %s39_s18, %s39_s18 }
   0xc   :  { %p2158_p3 = scmp.ne.s32.totalorder %s39_s18, %s2157_s26  ;;  %p2163_p5 = scmp.lt.s32.totalorder %s2157_s26, %s2157_s26 }
   0xe   :  { %p2164_p6 = por %p2163_p5, %p2162_p4 }
  0x10   :  { %p2165_p7 = pnand %p2164_p6, %p2158_p3 }
  0x12   :  { %2168 = shalt.err (!%p2165_p7)
}
  0x13   :  { %s2312_s27 = smov 128   ;;  %s2313_s28 = smov 8  }
  0x14   :  { %44 = dma.hbm_to_vmem [thread:$0]  %s2882_s1, 2048, %s39_s18, [#allocation6], %s2312_s27, %s2312_s27, %s2313_s28  }
  0x15   :  { %s2314_s12 = smov [#allocation8]   ;;  %s2315_s14 = smov [#allocation2]  }
  0x16   :  { %s66_s13 = sshll.u32 %s2314_s12, 4  ;;  %s26_s15 = sshll.u32 %s2315_s14, 4  ;;  %s67_s13 = int_to_ptr.vmem [resolvable:$true] %s66_s13  ;;  %s27_s15 = int_to_ptr.vmem [resolvable:$true] %s26_s15 }
  0x17   :  { %s2169_s19 = scalar_lea.hbm %s2886_s5, 2048 }
  0x18   :  { %p2170_p8 = scmp.ne.s32.totalorder %s2886_s5, %s2169_s19  ;;  %p2173_p9 = scmp.lt.u32.totalorder %s2169_s19, %s2886_s5 }
  0x1a   :  { %p2175_p10 = pnand %p2173_p9, %p2170_p8 }
  0x1c   :  { %2178 = shalt.err (!%p2175_p10)
}
  0x1d   :  { %s2179_s1 = scalar_lea.vmem %s67_s13, 2048  ;;  %p2184_p12 = scmp.lt.s32.totalorder %s67_s13, %s67_s13 }
  0x1e   :  { %p2180_p11 = scmp.ne.s32.totalorder %s67_s13, %s2179_s1  ;;  %p2185_p13 = scmp.lt.s32.totalorder %s2179_s1, %s2179_s1 }
  0x20   :  { %p2186_p0 = por %p2185_p13, %p2184_p12 }
  0x22   :  { %p2187_p1 = pnand %p2186_p0, %p2180_p11 }
  0x24   :  { %2190 = shalt.err (!%p2187_p1)
}
  0x25   :  { %72 = dma.hbm_to_vmem [thread:$0]  %s2886_s5, 2048, %s67_s13, [#allocation9], %s2312_s27, %s2312_s27, %s2313_s28  }
  0x26   :  { %s2191_s29 = scalar_lea.hbm %s2881_s0, 1024 }
  0x27   :  { %p2192_p2 = scmp.ne.s32.totalorder %s2881_s0, %s2191_s29  ;;  %p2195_p3 = scmp.lt.u32.totalorder %s2191_s29, %s2881_s0 }
  0x29   :  { %p2197_p4 = pnand %p2195_p3, %p2192_p2 }
  0x2b   :  { %2200 = shalt.err (!%p2197_p4)
}
  0x2c   :  { %s2201_s17 = scalar_lea.vmem %s27_s15, 1024  ;;  %p2206_p6 = scmp.lt.s32.totalorder %s27_s15, %s27_s15 }
  0x2d   :  { %p2202_p5 = scmp.ne.s32.totalorder %s27_s15, %s2201_s17  ;;  %p2207_p7 = scmp.lt.s32.totalorder %s2201_s17, %s2201_s17 }
  0x2f   :  { %p2208_p8 = por %p2207_p7, %p2206_p6 }
  0x31   :  { %p2209_p9 = pnand %p2208_p8, %p2202_p5 }
  0x33   :  { %2212 = shalt.err (!%p2209_p9)
}
  0x34   :  { %s2316_s5 = smov 64   ;;  %s2317_s13 = smov 4  }
  0x35   :  { %32 = dma.hbm_to_vmem [thread:$0]  %s2881_s0, 1024, %s27_s15, [#allocation3], %s2316_s5, %s2316_s5, %s2317_s13  }
  0x36   :  { %s2318_s21 = smov [#allocation7]   ;;  %s2319_s23 = smov [#allocation10]  }
  0x37   :  { %s52_s22 = sshll.u32 %s2318_s21, 4  ;;  %s80_s1 = sshll.u32 %s2319_s23, 4  ;;  %s53_s22 = int_to_ptr.vmem [resolvable:$true] %s52_s22  ;;  %s81_s1 = int_to_ptr.vmem [resolvable:$true] %s80_s1 }
  0x38   :  { %s2213_s25 = scalar_lea.hbm %s2884_s3, 2048 }
  0x39   :  { %p2214_p10 = scmp.ne.s32.totalorder %s2884_s3, %s2213_s25  ;;  %p2217_p11 = scmp.lt.u32.totalorder %s2213_s25, %s2884_s3 }
  0x3b   :  { %p2219_p12 = pnand %p2217_p11, %p2214_p10 }
  0x3d   :  { %2222 = shalt.err (!%p2219_p12)
}
  0x3e   :  { %s2223_s0 = scalar_lea.vmem %s53_s22, 2048  ;;  %p2228_p0 = scmp.lt.s32.totalorder %s53_s22, %s53_s22 }
  0x3f   :  { %p2224_p13 = scmp.ne.s32.totalorder %s53_s22, %s2223_s0  ;;  %p2229_p1 = scmp.lt.s32.totalorder %s2223_s0, %s2223_s0 }
  0x41   :  { %p2230_p2 = por %p2229_p1, %p2228_p0 }
  0x43   :  { %p2231_p3 = pnand %p2230_p2, %p2224_p13 }
  0x45   :  { %2234 = shalt.err (!%p2231_p3)
}
  0x46   :  { %58 = dma.hbm_to_vmem [thread:$0]  %s2884_s3, 2048, %s53_s22, [#allocation6], %s2312_s27, %s2312_s27, %s2313_s28  }
  0x47   :  { %s2235_s5 = scalar_lea.hbm %s2888_s7, 2048 }
  0x48   :  { %p2236_p4 = scmp.ne.s32.totalorder %s2888_s7, %s2235_s5  ;;  %p2239_p5 = scmp.lt.u32.totalorder %s2235_s5, %s2888_s7 }
  0x4a   :  { %p2241_p6 = pnand %p2239_p5, %p2236_p4 }
  0x4c   :  { %2244 = shalt.err (!%p2241_p6)
}
  0x4d   :  { %s2245_s23 = scalar_lea.vmem %s81_s1, 2048  ;;  %p2250_p8 = scmp.lt.s32.totalorder %s81_s1, %s81_s1 }
  0x4e   :  { %p2246_p7 = scmp.ne.s32.totalorder %s81_s1, %s2245_s23  ;;  %p2251_p9 = scmp.lt.s32.totalorder %s2245_s23, %s2245_s23 }
  0x50   :  { %p2252_p10 = por %p2251_p9, %p2250_p8 }
  0x52   :  { %p2253_p11 = pnand %p2252_p10, %p2246_p7 }
  0x54   :  { %2256 = shalt.err (!%p2253_p11)
}
  0x55   :  { %86 = dma.hbm_to_vmem [thread:$0]  %s2888_s7, 2048, %s81_s1, [#allocation9], %s2312_s27, %s2312_s27, %s2313_s28  }
  0x56   :  { %s2320_s18 = smov [#allocation11]   ;;  %s2257_s29 = scalar_lea.hbm %s2890_s9, 2048 }
  0x57   :  { %s94_s24 = sshll.u32 %s2320_s18, 4  ;;  %p2258_p12 = scmp.ne.s32.totalorder %s2890_s9, %s2257_s29  ;;  %s95_s24 = int_to_ptr.vmem [resolvable:$true] %s94_s24 }
  0x58   :  { %p2261_p13 = scmp.lt.u32.totalorder %s2257_s29, %s2890_s9 }
  0x5a   :  { %p2263_p0 = pnand %p2261_p13, %p2258_p12 }
  0x5c   :  { %2266 = shalt.err (!%p2263_p0)
}
  0x5d   :  { %s2267_s14 = scalar_lea.vmem %s95_s24, 2048  ;;  %p2272_p2 = scmp.lt.s32.totalorder %s95_s24, %s95_s24 }
  0x5e   :  { %p2268_p1 = scmp.ne.s32.totalorder %s95_s24, %s2267_s14  ;;  %p2273_p3 = scmp.lt.s32.totalorder %s2267_s14, %s2267_s14 }
  0x60   :  { %p2274_p4 = por %p2273_p3, %p2272_p2 }
  0x62   :  { %p2275_p5 = pnand %p2274_p4, %p2268_p1 }
  0x64   :  { %2278 = shalt.err (!%p2275_p5)
}
  0x65   :  { %100 = dma.hbm_to_vmem [thread:$0]  %s2890_s9, 2048, %s95_s24, [#allocation12], %s2312_s27, %s2312_s27, %s2313_s28  }
  0x66   :  { %2301 = dma.done.wait [#allocation3], 1024  }
  0x67   :  { %2302 = vsyncadd [#allocation3], 4294966272 }
  0x68   :  { %2303 = dma.done.wait [#allocation6], 4096  }
  0x69   :  { %2304 = vsyncadd [#allocation6], 4294963200 }
  0x6a   :  { %2305 = dma.done.wait [#allocation9], 4096  }
  0x6b   :  { %2306 = vsyncadd [#allocation9], 4294963200 }
  0x6c   :  { %2307 = dma.done.wait [#allocation12], 2048  }
  0x6d   :  { %2308 = vsyncadd [#allocation12], 4294965248  ;;  %v2472_v0 = vld [vmem:[#allocation5] sm:$0xff]  ;;  %v2474_v1 = vld [vmem:[#allocation5 + $0x8] sm:$0xff]  ;;  %vm2322_vm0 = vmmov 0  }
  0x6e   :  { %v2476_v2 = vld [vmem:[#allocation5 + $0x10] sm:$0xff]  ;;  %v2480_v3 = vpack.c.bf16 %v2474_v1, %v2472_v0  ;;  %v2482_v4 = vld [vmem:[#allocation5 + $0x18] sm:$0xff]  ;;  %v2484_v5 = vld [vmem:[#allocation5 + $0x20] sm:$0xff] }
  0x6f   :  { %v2486_v6 = vld [vmem:[#allocation5 + $0x28] sm:$0xff]  ;;  %v2490_v7 = vpack.c.bf16 %v2482_v4, %v2476_v2  ;;  %v2496_v9 = vld [vmem:[#allocation5 + $0x30] sm:$0xff]  ;;  %v2498_v10 = vld [vmem:[#allocation5 + $0x38] sm:$0xff] }
  0x70   :  { %v2494_v8 = vpack.c.bf16 %v2486_v6, %v2484_v5  ;;  %v162_v11 = vunpack.c.l.bf16 %v2480_v3  ;;  %v163_v12 = vunpack.c.h.bf16 %v2480_v3  ;;  %v2504_v13 = vpack.c.bf16 %v2498_v10, %v2496_v9  ;;  %v2510_v18 = vld [vmem:[#allocation5 + $0x40] sm:$0xff]  ;;  %v2512_v19 = vld [vmem:[#allocation5 + $0x48] sm:$0xff]  ;;  %v2516_v22 = vld [vmem:[#allocation5 + $0x50] sm:$0xff] }
  0x71   :  { %v164_v14 = vunpack.c.l.bf16 %v2490_v7  ;;  %v165_v15 = vunpack.c.h.bf16 %v2490_v7  ;;  %v2522_v27 = vld [vmem:[#allocation2] sm:$0xff]   ;;  %v2528_v31 = vpack.c.bf16 %v2512_v19, %v2510_v18  ;;  %v2530_v32 = vld [vmem:[#allocation5 + $0x58] sm:$0xff]  ;;  %v2543_v41 = vld [vmem:[#allocation5 + $0x68] sm:$0xff] }
  0x72   :  { %v166_v16 = vunpack.c.l.bf16 %v2494_v8  ;;  %v167_v17 = vunpack.c.h.bf16 %v2494_v8  ;;  %v178_v20 = vsub.f32 %v2472_v0, %v162_v11  ;;  %v179_v21 = vsub.f32 %v2474_v1, %v163_v12  ;;  %1639 = vmatprep.mubr.bf16.mxu0 %v2522_v27  ;;  %v2539_v37 = vld [vmem:[#allocation5 + $0x60] sm:$0xff]  ;;  %v461_v43 = vld [vmem:[#allocation7 + $0x8] sm:$0xff]  ;;  %v2550_v47 = vld [vmem:[#allocation5 + $0x70] sm:$0xff] }
  0x73   :  { %v180_v23 = vsub.f32 %v2476_v2, %v164_v14  ;;  %v181_v24 = vsub.f32 %v2482_v4, %v165_v15  ;;  %v168_v25 = vunpack.c.l.bf16 %v2504_v13  ;;  %v169_v26 = vunpack.c.h.bf16 %v2504_v13  ;;  %v460_v42 = vld [vmem:[#allocation7] sm:$0xff]  ;;  %v462_v49 = vld [vmem:[#allocation7 + $0x10] sm:$0xff]  ;;  %v463_v50 = vld [vmem:[#allocation7 + $0x18] sm:$0xff] }
  0x74   :  { %v194_v28 = vpack.c.bf16 %v179_v21, %v178_v20  ;;  %v182_v29 = vsub.f32 %v2484_v5, %v166_v16  ;;  %v183_v30 = vsub.f32 %v2486_v6, %v167_v17  ;;  %v2537_v36 = vpack.c.bf16 %v2530_v32, %v2516_v22  ;;  %v2555_v54 = vld [vmem:[#allocation5 + $0x78] sm:$0xff]  ;;  %v464_v56 = vld [vmem:[#allocation7 + $0x20] sm:$0xff]  ;;  %v465_v57 = vld [vmem:[#allocation7 + $0x28] sm:$0xff] }
  0x75   :  { %v195_v33 = vpack.c.bf16 %v181_v24, %v180_v23  ;;  %v184_v34 = vsub.f32 %v2496_v9, %v168_v25  ;;  %v185_v35 = vsub.f32 %v2498_v10, %v169_v26  ;;  %v170_v39 = vunpack.c.l.bf16 %v2528_v31  ;;  %v466_v12 = vld [vmem:[#allocation7 + $0x30] sm:$0xff]  ;;  %v467_v14 = vld [vmem:[#allocation7 + $0x38] sm:$0xff]  ;;  %v468_v24 = vld [vmem:[#allocation7 + $0x40] sm:$0xff] }
  0x76   :  { %1623 = vmatprep.subr.bf16.mxu0 %v194_v28  ;;  %v196_v38 = vpack.c.bf16 %v183_v30, %v182_v29  ;;  %v171_v40 = vunpack.c.h.bf16 %v2528_v31  ;;  %v172_v45 = vunpack.c.l.bf16 %v2537_v36  ;;  %v2548_v46 = vpack.c.bf16 %v2543_v41, %v2539_v37  ;;  %v469_v25 = vld [vmem:[#allocation7 + $0x48] sm:$0xff] }
  0x77   :  { %1624 = vmatpush3.bf16.msra.mxu0 %v194_v28  ;;  %v197_v44 = vpack.c.bf16 %v185_v35, %v184_v34  ;;  %v1973_v48 = vpack.c.bf16 %v461_v43, %v460_v42  ;;  %v186_v51 = vsub.f32 %v2510_v18, %v170_v39  ;;  %v173_v53 = vunpack.c.h.bf16 %v2537_v36  ;;  %v471_v34 = vld [vmem:[#allocation7 + $0x58] sm:$0xff]  ;;  %v472_v39 = vld [vmem:[#allocation7 + $0x60] sm:$0xff]  ;;  %v2571_v43 = vld [vmem:[#allocation2 + $0x8] sm:$0xff]  }
  0x78   :  { %1625 = vmatprep.subr.bf16.mxu0 %v195_v33  ;;  %v187_v52 = vsub.f32 %v2512_v19, %v171_v40  ;;  %v1977_v55 = vpack.c.bf16 %v463_v50, %v462_v49  ;;  %v174_v58 = vunpack.c.l.bf16 %v2548_v46  ;;  %v2560_v59 = vpack.c.bf16 %v2555_v54, %v2550_v47  ;;  %v473_v40 = vld [vmem:[#allocation7 + $0x68] sm:$0xff]  ;;  %v2593_v49 = vld [vmem:[#allocation2 + $0x30] sm:$0xff]  }
  0x79   :  { %1974 = vmatprep.subr.bf16.mxu1 %v1973_v48  ;;  %v1981_v60 = vpack.c.bf16 %v465_v57, %v464_v56  ;;  %v188_v62 = vsub.f32 %v2516_v22, %v172_v45  ;;  %v189_v63 = vsub.f32 %v2530_v32, %v173_v53  ;;  %v175_v11 = vunpack.c.h.bf16 %v2548_v46  ;;  %v2580_v45 = vld [vmem:[#allocation2 + $0x18] sm:$0xff]  }
  0x7a   :  { %1976 = vmatpush3.bf16.msra.mxu1 %v1973_v48  ;;  %v198_v61 = vpack.c.bf16 %v187_v52, %v186_v51  ;;  %v176_v15 = vunpack.c.l.bf16 %v2560_v59  ;;  %v1985_v16 = vpack.c.bf16 %v467_v14, %v466_v12  ;;  %v190_v20 = vsub.f32 %v2539_v37, %v174_v58  ;;  %v2583_v48 = vld [vmem:[#allocation2 + $0x20] sm:$0xff]  }
  0x7b   :  { %1626 = vmatpush3.bf16.msra.mxu0 %v195_v33  ;;  %1978 = vmatprep.subr.bf16.mxu1 %v1977_v55  ;;  %v199_v17 = vpack.c.bf16 %v189_v63, %v188_v62  ;;  %v191_v21 = vsub.f32 %v2543_v41, %v175_v11  ;;  %v177_v23 = vunpack.c.h.bf16 %v2560_v59  ;;  %v1989_v26 = vpack.c.bf16 %v469_v25, %v468_v24  ;;  %v470_v33 = vld [vmem:[#allocation7 + $0x50] sm:$0xff]  ;;  %v906_v25 = vld [vmem:[#allocation8 + $0x20] sm:$0xff] }
  0x7c   :  { %1627 = vmatprep.subr.bf16.mxu0 %v196_v38  ;;  %v192_v29 = vsub.f32 %v2550_v47, %v176_v15  ;;  %v1993_v35 = vpack.c.bf16 %v471_v34, %v470_v33  ;;  %v1997_v42 = vpack.c.bf16 %v473_v40, %v472_v39  ;;  %v912_v34 = vld [vmem:[#allocation8 + $0x50] sm:$0xff]  ;;  %v914_v39 = vld [vmem:[#allocation8 + $0x60] sm:$0xff]  ;;  %v915_v40 = vld [vmem:[#allocation8 + $0x68] sm:$0xff] }
  0x7d   :  { %v200_v28 = vpack.c.bf16 %v191_v21, %v190_v20  ;;  %v193_v30 = vsub.f32 %v2555_v54, %v177_v23  ;;  %v904_v21 = vld [vmem:[#allocation8 + $0x10] sm:$0xff] }
  0x7e   :  { %1980 = vmatpush3.bf16.msra.mxu1 %v1977_v55 }
  0x7f   :  { %1628 = vmatpush3.bf16.msra.mxu0 %v196_v38  ;;  %1982 = vmatprep.subr.bf16.mxu1 %v1981_v60  ;;  %v201_v38 = vpack.c.bf16 %v193_v30, %v192_v29  ;;  %v910_v29 = vld [vmem:[#allocation8 + $0x40] sm:$0xff]  ;;  %v911_v30 = vld [vmem:[#allocation8 + $0x48] sm:$0xff] }
  0x80   :  { %1629 = vmatprep.subr.bf16.mxu0 %v197_v44  ;;  %v2021_v33 = vpack.c.bf16 %v911_v30, %v910_v29 }
  0x82   :  { %1984 = vmatpush3.bf16.msra.mxu1 %v1981_v60 }
  0x83   :  { %1630 = vmatpush3.bf16.msra.mxu0 %v197_v44  ;;  %1986 = vmatprep.subr.bf16.mxu1 %v1985_v16  ;;  %v2573_v44 = vld [vmem:[#allocation2 + $0x10] sm:$0xff]  }
  0x84   :  { %1631 = vmatprep.subr.bf16.mxu0 %v198_v61 }
  0x86   :  { %1988 = vmatpush3.bf16.msra.mxu1 %v1985_v16 }
  0x87   :  { %1632 = vmatpush3.bf16.msra.mxu0 %v198_v61  ;;  %1990 = vmatprep.subr.bf16.mxu1 %v1989_v26 }
  0x88   :  { %1633 = vmatprep.subr.bf16.mxu0 %v199_v17 }
  0x8a   :  { %1992 = vmatpush3.bf16.msra.mxu1 %v1989_v26  ;;  %v907_v26 = vld [vmem:[#allocation8 + $0x28] sm:$0xff] }
  0x8b   :  { %1634 = vmatpush3.bf16.msra.mxu0 %v199_v17  ;;  %1994 = vmatprep.subr.bf16.mxu1 %v1993_v35 }
  0x8c   :  { %1635 = vmatprep.subr.bf16.mxu0 %v200_v28 }
  0x8e   :  { %1996 = vmatpush3.bf16.msra.mxu1 %v1993_v35  ;;  %v913_v35 = vld [vmem:[#allocation8 + $0x58] sm:$0xff] }
  0x8f   :  { %1636 = vmatpush3.bf16.msra.mxu0 %v200_v28  ;;  %1998 = vmatprep.subr.bf16.mxu1 %v1997_v42  ;;  %v909_v28 = vld [vmem:[#allocation8 + $0x38] sm:$0xff] }
  0x90   :  { %1637 = vmatprep.subr.bf16.mxu0 %v201_v38 }
  0x92   :  { %2000 = vmatpush3.bf16.msra.mxu1 %v1997_v42  ;;  %v2029_v42 = vpack.c.bf16 %v915_v40, %v914_v39 }
  0x93   :  { %1638 = vmatpush3.bf16.msra.mxu0 %v201_v38  ;;  %v2025_v38 = vpack.c.bf16 %v913_v35, %v912_v34 }
  0x94   :  { %1655 = vmatprep.subr.bf16.mxu0 %v2480_v3 }
  0x96   :  { %1640 = vmatmul.mubr.bf16.vlgmr.msra.gmra.mrb[0].mxu0 %v2571_v43 }
  0x97   :  { %1656 = vmatpush3.bf16.msra.mxu0 %v2480_v3  ;;  %1643 = vmatprep.mubr.bf16.mxu0 %v2573_v44  ;;  %v2590_v3 = vld [vmem:[#allocation2 + $0x28] sm:$0xff]  }
  0x98   :  { %1657 = vmatprep.subr.bf16.mxu0 %v2490_v7 }
  0x9b   :  { %1658 = vmatpush3.bf16.msra.mxu0 %v2490_v7  ;;  %v2600_v7 = vld [vmem:[#allocation2 + $0x38] sm:$0xff]  }
  0x9c   :  { %1659 = vmatprep.subr.bf16.mxu0 %v2494_v8 }
  0x9e   :  { %1644 = vmatmul.mubr.bf16.gmra.mrb[4].mxu0 %v2580_v45 }
  0x9f   :  { %1660 = vmatpush3.bf16.msra.mxu0 %v2494_v8  ;;  %1647 = vmatprep.mubr.bf16.mxu0 %v2583_v48  ;;  %v474_v8 = vld [vmem:[#allocation7 + $0x70] sm:$0xff] }
  0xa0   :  { %1661 = vmatprep.subr.bf16.mxu0 %v2504_v13 }
  0xa3   :  { %1662 = vmatpush3.bf16.msra.mxu0 %v2504_v13  ;;  %v475_v13 = vld [vmem:[#allocation7 + $0x78] sm:$0xff] }
  0xa4   :  { %1663 = vmatprep.subr.bf16.mxu0 %v2528_v31 }
  0xa6   :  { %1648 = vmatmul.mubr.bf16.gmra.mrb[8].mxu0 %v2590_v3 }
  0xa7   :  { %1664 = vmatpush3.bf16.msra.mxu0 %v2528_v31  ;;  %1651 = vmatprep.mubr.bf16.mxu0 %v2593_v49  ;;  %v2001_v31 = vpack.c.bf16 %v475_v13, %v474_v8  ;;  %v2636_v8 = vld [vmem:[%s2885_s4] ss:$0 sm:$0xff] }
  0xa8   :  { %1665 = vmatprep.subr.bf16.mxu0 %v2537_v36 }
  0xa9   :  { %2002 = vmatprep.subr.bf16.mxu1 %v2001_v31 }
  0xaa   :  { %2004 = vmatpush3.bf16.msra.mxu1 %v2001_v31 }
  0xab   :  { %1666 = vmatpush3.bf16.msra.mxu0 %v2537_v36 }
  0xac   :  { %1667 = vmatprep.subr.bf16.mxu0 %v2548_v46 }
  0xae   :  { %1652 = vmatmul.mubr.bf16.gmra.mrb[12].mxu0 %v2600_v7 }
  0xaf   :  { %1668 = vmatpush3.bf16.msra.mxu0 %v2548_v46  ;;  %1671 = vmatprep.mubr.bf16.mxu0 %v2522_v27 }
  0xb0   :  { %1669 = vmatprep.subr.bf16.mxu0 %v2560_v59 }
  0xb3   :  { %1670 = vmatpush3.bf16.msra.mxu0 %v2560_v59 }
  0xb6   :  { %1672 = vmatmul.mubr.bf16.vlgmr.msra.gmra.mrb[0].mxu0 %v2571_v43 }
  0xb7   :  { %1675 = vmatprep.mubr.bf16.mxu0 %v2573_v44 }
  0xbe   :  { %1676 = vmatmul.mubr.bf16.gmra.mrb[4].mxu0 %v2580_v45 }
  0xbf   :  { %1679 = vmatprep.mubr.bf16.mxu0 %v2583_v48 }
  0xc6   :  { %1680 = vmatmul.mubr.bf16.gmra.mrb[8].mxu0 %v2590_v3 }
  0xc7   :  { %1683 = vmatprep.mubr.bf16.mxu0 %v2593_v49 }
  0xce   :  { %1684 = vmatmul.mubr.bf16.gmra.mrb[12].mxu0 %v2600_v7 }
 0x189   :  { %v1673_v36 = vpop.f32.mrb[0].mxu0 }
 0x18a   :  { %v381_v46 = vpop.f32.mrb[1].mxu0  ;;  %v446_v55 = vadd.f32 %v1673_v36, %v2476_v2 }
 0x18b   :  { %v1674_v50 = vpop.f32.mrb[2].mxu0  ;;  %v444_v51 = vadd.f32 %v381_v46, %v2472_v0 }
 0x18c   :  { %v384_v52 = vpop.f32.mrb[3].mxu0  ;;  %v447_v56 = vadd.f32 %v1674_v50, %v2482_v4 }
 0x18d   :  { %v445_v53 = vadd.f32 %v384_v52, %v2474_v1  ;;  %1719 = vmatprep.mubr.f32.mxu1 %v444_v51 }
 0x18f   :  { %1720 = vmatmul.mubr.f32.vlgmr.msra.gmra.mrb[0].mxu1 %v445_v53 }
 0x190   :  { %1722 = vmatprep.mubr.f32.mxu1 %v446_v55 }
 0x191   :  { %v1677_v57 = vpop.f32.mrb[4].mxu0 }
 0x192   :  { %v397_v58 = vpop.f32.mrb[5].mxu0  ;;  %v450_v0 = vadd.f32 %v1677_v57, %v2496_v9 }
 0x193   :  { %v448_v59 = vadd.f32 %v397_v58, %v2484_v5  ;;  %v1678_v60 = vpop.f32.mrb[6].mxu0  ;;  %1723 = vmatmul.mubr.f32.gmra.mrb[2].mxu1 %v447_v56 }
 0x194   :  { %v400_v61 = vpop.f32.mrb[7].mxu0  ;;  %v451_v1 = vadd.f32 %v1678_v60, %v2498_v10 }
 0x195   :  { %v449_v62 = vadd.f32 %v400_v61, %v2486_v6  ;;  %1725 = vmatprep.mubr.f32.mxu1 %v448_v59 }
 0x197   :  { %1726 = vmatmul.mubr.f32.gmra.mrb[4].mxu1 %v449_v62 }
 0x198   :  { %1728 = vmatprep.mubr.f32.mxu1 %v450_v0 }
 0x199   :  { %v1681_v2 = vpop.f32.mrb[8].mxu0 }
 0x19a   :  { %v413_v63 = vpop.f32.mrb[9].mxu0  ;;  %v454_v14 = vadd.f32 %v1681_v2, %v2516_v22  ;;  %v902_v22 = vld [vmem:[#allocation8] sm:$0xff] }
 0x19b   :  { %v452_v4 = vadd.f32 %v413_v63, %v2510_v18  ;;  %v1682_v11 = vpop.f32.mrb[10].mxu0  ;;  %1729 = vmatmul.mubr.f32.gmra.mrb[6].mxu1 %v451_v1 }
 0x19c   :  { %v416_v12 = vpop.f32.mrb[11].mxu0  ;;  %v455_v6 = vadd.f32 %v1682_v11, %v2530_v32  ;;  %v903_v32 = vld [vmem:[#allocation8 + $0x8] sm:$0xff] }
 0x19d   :  { %v453_v5 = vadd.f32 %v416_v12, %v2512_v19  ;;  %1731 = vmatprep.mubr.f32.mxu1 %v452_v4  ;;  %v2005_v23 = vpack.c.bf16 %v903_v32, %v902_v22 }
 0x19f   :  { %1732 = vmatmul.mubr.f32.gmra.mrb[8].mxu1 %v453_v5  ;;  %2006 = vmatprep.subr.bf16.mxu0 %v2005_v23 }
 0x1a0   :  { %1734 = vmatprep.mubr.f32.mxu1 %v454_v14  ;;  %2008 = vmatpush3.bf16.msra.mxu0 %v2005_v23 }
 0x1a1   :  { %v1685_v9 = vpop.f32.mrb[12].mxu0 }
 0x1a2   :  { %v429_v15 = vpop.f32.mrb[13].mxu0  ;;  %v458_v20 = vadd.f32 %v1685_v9, %v2550_v47  ;;  %v908_v47 = vld [vmem:[#allocation8 + $0x30] sm:$0xff] }
 0x1a3   :  { %v456_v10 = vadd.f32 %v429_v15, %v2539_v37  ;;  %v1686_v16 = vpop.f32.mrb[14].mxu0  ;;  %1735 = vmatmul.mubr.f32.gmra.mrb[10].mxu1 %v455_v6  ;;  %v905_v37 = vld [vmem:[#allocation8 + $0x18] sm:$0xff] }
 0x1a4   :  { %v432_v17 = vpop.f32.mrb[15].mxu0  ;;  %v459_v19 = vadd.f32 %v1686_v16, %v2555_v54  ;;  %v2009_v24 = vpack.c.bf16 %v905_v37, %v904_v21  ;;  %v2017_v54 = vpack.c.bf16 %v909_v28, %v908_v47 }
 0x1a5   :  { %v457_v18 = vadd.f32 %v432_v17, %v2543_v41  ;;  %1737 = vmatprep.mubr.f32.mxu1 %v456_v10  ;;  %v2013_v41 = vpack.c.bf16 %v907_v26, %v906_v25 }
 0x1a6   :  { %2010 = vmatprep.subr.bf16.mxu0 %v2009_v24 }
 0x1a7   :  { %1738 = vmatmul.mubr.f32.gmra.mrb[12].mxu1 %v457_v18  ;;  %2012 = vmatpush3.bf16.msra.mxu0 %v2009_v24 }
 0x1a8   :  { %1740 = vmatprep.mubr.f32.mxu1 %v458_v20  ;;  %2014 = vmatprep.subr.bf16.mxu0 %v2013_v41 }
 0x1ab   :  { %1741 = vmatmul.mubr.f32.gmra.mrb[14].mxu1 %v459_v19  ;;  %2016 = vmatpush3.bf16.msra.mxu0 %v2013_v41 }
 0x1ac   :  { %1759 = vmatprep.mubr.bf16.mxu1 %v2522_v27  ;;  %2018 = vmatprep.subr.bf16.mxu0 %v2017_v54 }
 0x1af   :  { %2020 = vmatpush3.bf16.msra.mxu0 %v2017_v54 }
 0x1b0   :  { %2022 = vmatprep.subr.bf16.mxu0 %v2021_v33 }
 0x1b3   :  { %2024 = vmatpush3.bf16.msra.mxu0 %v2021_v33 }
 0x1b4   :  { %2026 = vmatprep.subr.bf16.mxu0 %v2025_v38 }
 0x1b7   :  { %2028 = vmatpush3.bf16.msra.mxu0 %v2025_v38 }
 0x1b8   :  { %2030 = vmatprep.subr.bf16.mxu0 %v2029_v42 }
 0x1bb   :  { %2032 = vmatpush3.bf16.msra.mxu0 %v2029_v42 }
 0x262   :  { %v1721_v13 = vpop.f32.mrb[0].mxu1 }
 0x263   :  { %v555_v31 = vadd.f32 %v1721_v13, %v2636_v8  ;;  %v549_v36 = vpop.f32.mrb[1].mxu1 }
 0x264   :  { %v550_v46 = vadd.f32 %v2636_v8, %v549_v36 }
 0x265   :  { %v2640_v50 = vmax.f32 %v555_v31, 0.0 }
 0x266   :  { %v2642_v51 = vmax.f32 %v550_v46, 0.0  ;;  %v1724_v52 = vpop.f32.mrb[2].mxu1 }
 0x267   :  { %v565_v53 = vadd.f32 %v1724_v52, %v2636_v8  ;;  %v559_v55 = vpop.f32.mrb[3].mxu1 }
 0x268   :  { %v2647_v56 = vpack.c.bf16 %v2640_v50, %v2642_v51  ;;  %v560_v57 = vadd.f32 %v2636_v8, %v559_v55 }
 0x269   :  { %v2650_v58 = vmax.f32 %v565_v53, 0.0 }
 0x26a   :  { %v652_v59 = vunpack.c.l.bf16 %v2647_v56  ;;  %v2653_v60 = vmax.f32 %v560_v57, 0.0  ;;  %v1727_v61 = vpop.f32.mrb[4].mxu1  ;;  %v653_v62 = vunpack.c.h.bf16 %v2647_v56 }
 0x26b   :  { %v575_v0 = vadd.f32 %v1727_v61, %v2636_v8  ;;  %v569_v1 = vpop.f32.mrb[5].mxu1 }
 0x26c   :  { %v668_v2 = vsub.f32 %v2642_v51, %v652_v59  ;;  %v2660_v63 = vpack.c.bf16 %v2650_v58, %v2653_v60  ;;  %v570_v4 = vadd.f32 %v2636_v8, %v569_v1  ;;  %v669_v11 = vsub.f32 %v2640_v50, %v653_v62 }
 0x26d   :  { %v2664_v12 = vmax.f32 %v575_v0, 0.0 }
 0x26e   :  { %v654_v5 = vunpack.c.l.bf16 %v2660_v63  ;;  %v2667_v14 = vmax.f32 %v570_v4, 0.0  ;;  %v1730_v6 = vpop.f32.mrb[6].mxu1  ;;  %v684_v9 = vpack.c.bf16 %v669_v11, %v668_v2  ;;  %v655_v15 = vunpack.c.h.bf16 %v2660_v63 }
 0x26f   :  { %v585_v10 = vadd.f32 %v1730_v6, %v2636_v8  ;;  %v579_v16 = vpop.f32.mrb[7].mxu1 }
 0x270   :  { %v670_v17 = vsub.f32 %v2653_v60, %v654_v5  ;;  %v2674_v18 = vpack.c.bf16 %v2664_v12, %v2667_v14  ;;  %v580_v20 = vadd.f32 %v2636_v8, %v579_v16  ;;  %1743 = vmatprep.subr.bf16.mxu1 %v684_v9  ;;  %v671_v19 = vsub.f32 %v2650_v58, %v655_v15 }
 0x271   :  { %v2678_v22 = vmax.f32 %v585_v10, 0.0  ;;  %1744 = vmatpush3.bf16.msra.mxu1 %v684_v9 }
 0x272   :  { %v656_v32 = vunpack.c.l.bf16 %v2674_v18  ;;  %v2681_v21 = vmax.f32 %v580_v20, 0.0  ;;  %v1733_v23 = vpop.f32.mrb[8].mxu1  ;;  %v685_v37 = vpack.c.bf16 %v671_v19, %v670_v17  ;;  %v657_v24 = vunpack.c.h.bf16 %v2674_v18 }
 0x273   :  { %v595_v25 = vadd.f32 %v1733_v23, %v2636_v8  ;;  %v589_v26 = vpop.f32.mrb[9].mxu1 }
 0x274   :  { %v672_v41 = vsub.f32 %v2667_v14, %v656_v32  ;;  %v2688_v47 = vpack.c.bf16 %v2678_v22, %v2681_v21  ;;  %v590_v28 = vadd.f32 %v2636_v8, %v589_v26  ;;  %1745 = vmatprep.subr.bf16.mxu1 %v685_v37  ;;  %v673_v54 = vsub.f32 %v2664_v12, %v657_v24 }
 0x275   :  { %v2692_v29 = vmax.f32 %v595_v25, 0.0  ;;  %1746 = vmatpush3.bf16.msra.mxu1 %v685_v37 }
 0x276   :  { %v658_v30 = vunpack.c.l.bf16 %v2688_v47  ;;  %v2695_v33 = vmax.f32 %v590_v28, 0.0  ;;  %v1736_v34 = vpop.f32.mrb[10].mxu1  ;;  %v686_v35 = vpack.c.bf16 %v673_v54, %v672_v41  ;;  %v659_v38 = vunpack.c.h.bf16 %v2688_v47 }
 0x277   :  { %v605_v39 = vadd.f32 %v1736_v34, %v2636_v8  ;;  %v599_v40 = vpop.f32.mrb[11].mxu1 }
 0x278   :  { %v674_v42 = vsub.f32 %v2681_v21, %v658_v30  ;;  %v2702_v13 = vpack.c.bf16 %v2692_v29, %v2695_v33  ;;  %v600_v31 = vadd.f32 %v2636_v8, %v599_v40  ;;  %1747 = vmatprep.subr.bf16.mxu1 %v686_v35  ;;  %v675_v36 = vsub.f32 %v2678_v22, %v659_v38 }
 0x279   :  { %v2706_v46 = vmax.f32 %v605_v39, 0.0  ;;  %1748 = vmatpush3.bf16.msra.mxu1 %v686_v35 }
 0x27a   :  { %v660_v52 = vunpack.c.l.bf16 %v2702_v13  ;;  %v2709_v53 = vmax.f32 %v600_v31, 0.0  ;;  %v1739_v55 = vpop.f32.mrb[12].mxu1  ;;  %v687_v57 = vpack.c.bf16 %v675_v36, %v674_v42  ;;  %v661_v59 = vunpack.c.h.bf16 %v2702_v13 }
 0x27b   :  { %v615_v61 = vadd.f32 %v1739_v55, %v2636_v8  ;;  %v609_v62 = vpop.f32.mrb[13].mxu1 }
 0x27c   :  { %v676_v0 = vsub.f32 %v2695_v33, %v660_v52  ;;  %v649_v1 = vpack.c.bf16 %v2706_v46, %v2709_v53  ;;  %v610_v2 = vadd.f32 %v2636_v8, %v609_v62  ;;  %1749 = vmatprep.subr.bf16.mxu1 %v687_v57  ;;  %v677_v4 = vsub.f32 %v2692_v29, %v661_v59 }
 0x27d   :  { %v2718_v11 = vmax.f32 %v615_v61, 0.0  ;;  %1750 = vmatpush3.bf16.msra.mxu1 %v687_v57 }
 0x27e   :  { %v662_v5 = vunpack.c.l.bf16 %v649_v1  ;;  %v2720_v6 = vmax.f32 %v610_v2, 0.0  ;;  %v1742_v9 = vpop.f32.mrb[14].mxu1  ;;  %v688_v15 = vpack.c.bf16 %v677_v4, %v676_v0  ;;  %v663_v10 = vunpack.c.h.bf16 %v649_v1  ;;  %v1216_v4 = vld [vmem:[#allocation10 + $0x8] sm:$0xff] }
 0x27f   :  { %v625_v16 = vadd.f32 %v1742_v9, %v2636_v8  ;;  %v619_v17 = vpop.f32.mrb[15].mxu1  ;;  %v1218_v9 = vld [vmem:[#allocation10 + $0x18] sm:$0xff] }
 0x280   :  { %v678_v20 = vsub.f32 %v2709_v53, %v662_v5  ;;  %v650_v19 = vpack.c.bf16 %v2718_v11, %v2720_v6  ;;  %v620_v32 = vadd.f32 %v2636_v8, %v619_v17  ;;  %1751 = vmatprep.subr.bf16.mxu1 %v688_v15  ;;  %v679_v23 = vsub.f32 %v2706_v46, %v663_v10  ;;  %v1219_v10 = vld [vmem:[#allocation10 + $0x20] sm:$0xff] }
 0x281   :  { %v2728_v37 = vmax.f32 %v625_v16, 0.0  ;;  %1752 = vmatpush3.bf16.msra.mxu1 %v688_v15  ;;  %v2323_v5 = vmov 0.0|0.0   ;;  %v1220_v16 = vld [vmem:[#allocation10 + $0x28] sm:$0xff] }
 0x282   :  { %v664_v24 = vunpack.c.l.bf16 %v650_v19  ;;  %v2730_v25 = vmax.f32 %v620_v32, 0.0  ;;  %v689_v26 = vpack.c.bf16 %v679_v23, %v678_v20  ;;  %v665_v41 = vunpack.c.h.bf16 %v650_v19  ;;  %v1221_v20 = vld [vmem:[#allocation10 + $0x30] sm:$0xff]  ;;  %v1223_v23 = vld [vmem:[#allocation10 + $0x40] sm:$0xff] }
 0x283   :  { %v2044_v17 = vpack.c.bf16 %v1220_v16, %v1219_v10 }
 0x284   :  { %v680_v28 = vsub.f32 %v2720_v6, %v664_v24  ;;  %v651_v54 = vpack.c.bf16 %v2728_v37, %v2730_v25  ;;  %1753 = vmatprep.subr.bf16.mxu1 %v689_v26  ;;  %v681_v30 = vsub.f32 %v2718_v11, %v665_v41 }
 0x285   :  { %1754 = vmatpush3.bf16.msra.mxu1 %v689_v26  ;;  %v1226_v26 = vld [vmem:[#allocation10 + $0x58] sm:$0xff] }
 0x286   :  { %v666_v8 = vunpack.c.l.bf16 %v651_v54  ;;  %v690_v34 = vpack.c.bf16 %v681_v30, %v680_v28  ;;  %v667_v35 = vunpack.c.h.bf16 %v651_v54  ;;  %v1227_v28 = vld [vmem:[#allocation10 + $0x60] sm:$0xff] }
 0x288   :  { %v682_v38 = vsub.f32 %v2730_v25, %v666_v8  ;;  %1755 = vmatprep.subr.bf16.mxu1 %v690_v34  ;;  %v683_v39 = vsub.f32 %v2728_v37, %v667_v35  ;;  %v1229_v8 = vld [vmem:[#allocation10 + $0x70] sm:$0xff] }
 0x289   :  { %1756 = vmatpush3.bf16.msra.mxu1 %v690_v34  ;;  %v1230_v34 = vld [vmem:[#allocation10 + $0x78] sm:$0xff] }
 0x28a   :  { %v691_v40 = vpack.c.bf16 %v683_v39, %v682_v38  ;;  %v2059_v35 = vpack.c.bf16 %v1230_v34, %v1229_v8  ;;  %v2796_v38 = vld [vmem:[%s2887_s6] ss:$0 sm:$0xff] }
 0x28c   :  { %1757 = vmatprep.subr.bf16.mxu1 %v691_v40 }
 0x28d   :  { %1758 = vmatpush3.bf16.msra.mxu1 %v691_v40 }
 0x28e   :  { %1775 = vmatprep.subr.bf16.mxu1 %v2647_v56 }
 0x290   :  { %1760 = vmatmul.mubr.bf16.vlgmr.msra.gmra.mrb[16].mxu1 %v2571_v43 }
 0x291   :  { %1776 = vmatpush3.bf16.msra.mxu1 %v2647_v56  ;;  %1763 = vmatprep.mubr.bf16.mxu1 %v2573_v44  ;;  %v916_v56 = vld [vmem:[#allocation8 + $0x70] sm:$0xff] }
 0x292   :  { %1777 = vmatprep.subr.bf16.mxu1 %v2660_v63 }
 0x295   :  { %1778 = vmatpush3.bf16.msra.mxu1 %v2660_v63  ;;  %v917_v63 = vld [vmem:[#allocation8 + $0x78] sm:$0xff] }
 0x296   :  { %1779 = vmatprep.subr.bf16.mxu1 %v2674_v18 }
 0x298   :  { %1764 = vmatmul.mubr.bf16.gmra.mrb[20].mxu1 %v2580_v45 }
 0x299   :  { %1780 = vmatpush3.bf16.msra.mxu1 %v2674_v18  ;;  %1767 = vmatprep.mubr.bf16.mxu1 %v2583_v48  ;;  %v2033_v18 = vpack.c.bf16 %v917_v63, %v916_v56 }
 0x29a   :  { %1781 = vmatprep.subr.bf16.mxu1 %v2688_v47 }
 0x29b   :  { %2034 = vmatprep.subr.bf16.mxu0 %v2033_v18 }
 0x29c   :  { %2036 = vmatpush3.bf16.msra.mxu0 %v2033_v18 }
 0x29d   :  { %1782 = vmatpush3.bf16.msra.mxu1 %v2688_v47 }
 0x29e   :  { %1783 = vmatprep.subr.bf16.mxu1 %v2702_v13 }
 0x2a0   :  { %1768 = vmatmul.mubr.bf16.gmra.mrb[24].mxu1 %v2590_v3 }
 0x2a1   :  { %1784 = vmatpush3.bf16.msra.mxu1 %v2702_v13  ;;  %1771 = vmatprep.mubr.bf16.mxu1 %v2593_v49 }
 0x2a2   :  { %1785 = vmatprep.subr.bf16.mxu1 %v649_v1 }
 0x2a5   :  { %1786 = vmatpush3.bf16.msra.mxu1 %v649_v1 }
 0x2a6   :  { %1787 = vmatprep.subr.bf16.mxu1 %v650_v19 }
 0x2a8   :  { %1772 = vmatmul.mubr.bf16.gmra.mrb[28].mxu1 %v2600_v7 }
 0x2a9   :  { %1788 = vmatpush3.bf16.msra.mxu1 %v650_v19  ;;  %1791 = vmatprep.mubr.bf16.mxu1 %v2522_v27  ;;  %v1222_v19 = vld [vmem:[#allocation10 + $0x38] sm:$0xff] }
 0x2aa   :  { %1789 = vmatprep.subr.bf16.mxu1 %v651_v54  ;;  %v2047_v32 = vpack.c.bf16 %v1222_v19, %v1221_v20 }
 0x2ad   :  { %1790 = vmatpush3.bf16.msra.mxu1 %v651_v54  ;;  %v1228_v54 = vld [vmem:[#allocation10 + $0x68] sm:$0xff] }
 0x2ae   :  { %2037 = vmatprep.subr.bf16.mxu1 %v2323_v5  ;;  %v2056_v30 = vpack.c.bf16 %v1228_v54, %v1227_v28 }
 0x2b0   :  { %1792 = vmatmul.mubr.bf16.vlgmr.msra.gmra.mrb[16].mxu1 %v2571_v43 }
 0x2b1   :  { %1795 = vmatprep.mubr.bf16.mxu1 %v2573_v44 }
 0x2b8   :  { %1796 = vmatmul.mubr.bf16.gmra.mrb[20].mxu1 %v2580_v45 }
 0x2b9   :  { %1799 = vmatprep.mubr.bf16.mxu1 %v2583_v48 }
 0x2c0   :  { %1800 = vmatmul.mubr.bf16.gmra.mrb[24].mxu1 %v2590_v3 }
 0x2c1   :  { %1803 = vmatprep.mubr.bf16.mxu1 %v2593_v49 }
 0x2c8   :  { %1804 = vmatmul.mubr.bf16.gmra.mrb[28].mxu1 %v2600_v7 }
 0x383   :  { %v1793_v27 = vpop.f32.mrb[16].mxu1 }
 0x384   :  { %v823_v47 = vpop.f32.mrb[17].mxu1  ;;  %v888_v48 = vadd.f32 %v1793_v27, %v2653_v60 }
 0x385   :  { %v886_v43 = vadd.f32 %v823_v47, %v2642_v51  ;;  %v1794_v44 = vpop.f32.mrb[18].mxu1 }
 0x386   :  { %v826_v42 = vpop.f32.mrb[19].mxu1  ;;  %v889_v3 = vadd.f32 %v1794_v44, %v2650_v58 }
 0x387   :  { %v887_v45 = vadd.f32 %v826_v42, %v2640_v50  ;;  %1839 = vmatprep.mubr.f32.mxu0 %v886_v43 }
 0x389   :  { %1840 = vmatmul.mubr.f32.vlgmr.msra.gmra.mrb[16].mxu0 %v887_v45 }
 0x38a   :  { %1842 = vmatprep.mubr.f32.mxu0 %v888_v48 }
 0x38b   :  { %v1797_v49 = vpop.f32.mrb[20].mxu1 }
 0x38c   :  { %v839_v7 = vpop.f32.mrb[21].mxu1  ;;  %v892_v52 = vadd.f32 %v1797_v49, %v2681_v21 }
 0x38d   :  { %v890_v13 = vadd.f32 %v839_v7, %v2667_v14  ;;  %v1798_v31 = vpop.f32.mrb[22].mxu1  ;;  %1843 = vmatmul.mubr.f32.gmra.mrb[18].mxu0 %v889_v3 }
 0x38e   :  { %v842_v36 = vpop.f32.mrb[23].mxu1  ;;  %v893_v50 = vadd.f32 %v1798_v31, %v2678_v22 }
 0x38f   :  { %v891_v51 = vadd.f32 %v842_v36, %v2664_v12  ;;  %1845 = vmatprep.mubr.f32.mxu0 %v890_v13 }
 0x391   :  { %1846 = vmatmul.mubr.f32.gmra.mrb[20].mxu0 %v891_v51 }
 0x392   :  { %1848 = vmatprep.mubr.f32.mxu0 %v892_v52 }
 0x393   :  { %v1801_v60 = vpop.f32.mrb[24].mxu1 }
 0x394   :  { %v855_v55 = vpop.f32.mrb[25].mxu1  ;;  %v896_v61 = vadd.f32 %v1801_v60, %v2709_v53  ;;  %v2321_v53 = vmov 0.0  }
 0x395   :  { %v894_v58 = vadd.f32 %v855_v55, %v2695_v33  ;;  %v1802_v57 = vpop.f32.mrb[26].mxu1  ;;  %1849 = vmatmul.mubr.f32.gmra.mrb[22].mxu0 %v893_v50  ;;  %1863 = vmatprep.subr.bf16.mxu0 %v2321_v53 }
 0x396   :  { %v858_v59 = vpop.f32.mrb[27].mxu1  ;;  %v897_v12 = vadd.f32 %v1802_v57, %v2706_v46  ;;  %1935 = vmatprep.mubr.msk.f32.mxu1 %vm2322_vm0, %v2321_v53  ;;  %v1215_v46 = vld [vmem:[#allocation10] sm:$0xff] }
 0x397   :  { %v895_v14 = vadd.f32 %v858_v59, %v2692_v29  ;;  %1851 = vmatprep.mubr.f32.mxu0 %v894_v58 }
 0x399   :  { %1852 = vmatmul.mubr.f32.gmra.mrb[24].mxu0 %v895_v14 }
 0x39a   :  { %1854 = vmatprep.mubr.f32.mxu0 %v896_v61 }
 0x39b   :  { %v1805_v21 = vpop.f32.mrb[28].mxu1 }
 0x39c   :  { %v871_v62 = vpop.f32.mrb[29].mxu1  ;;  %v900_v2 = vadd.f32 %v1805_v21, %v2730_v25  ;;  %v1225_v25 = vld [vmem:[#allocation10 + $0x50] sm:$0xff] }
 0x39d   :  { %v898_v22 = vadd.f32 %v871_v62, %v2720_v6  ;;  %v1806_v0 = vpop.f32.mrb[30].mxu1  ;;  %1855 = vmatmul.mubr.f32.gmra.mrb[26].mxu0 %v897_v12  ;;  %v2038_v6 = vpack.c.bf16 %v1216_v4, %v1215_v46  ;;  %v2053_v41 = vpack.c.bf16 %v1226_v26, %v1225_v25 }
 0x39e   :  { %v874_v1 = vpop.f32.mrb[31].mxu1  ;;  %v901_v29 = vadd.f32 %v1806_v0, %v2728_v37  ;;  %v1224_v37 = vld [vmem:[#allocation10 + $0x48] sm:$0xff] }
 0x39f   :  { %v899_v33 = vadd.f32 %v874_v1, %v2718_v11  ;;  %1857 = vmatprep.mubr.f32.mxu0 %v898_v22  ;;  %v1217_v11 = vld [vmem:[#allocation10 + $0x10] sm:$0xff]  ;;  %2039 = vmatpush3.bf16.msra.mxu1 %v2038_v6  ;;  %v2050_v24 = vpack.c.bf16 %v1224_v37, %v1223_v23 }
 0x3a0   :  { %v2041_v15 = vpack.c.bf16 %v1218_v9, %v1217_v11  ;;  %2040 = vmatprep.subr.bf16.mxu1 %v2323_v5 }
 0x3a1   :  { %1858 = vmatmul.mubr.f32.gmra.mrb[28].mxu0 %v899_v33 }
 0x3a2   :  { %1860 = vmatprep.mubr.f32.mxu0 %v900_v2 }
 0x3a3   :  { %2042 = vmatpush3.bf16.msra.mxu1 %v2041_v15 }
 0x3a4   :  { %2043 = vmatprep.subr.bf16.mxu1 %v2323_v5 }
 0x3a5   :  { %1861 = vmatmul.mubr.f32.gmra.mrb[30].mxu0 %v901_v29 }
 0x3a6   :  { %1879 = vmatprep.mubr.msk.bf16.mxu0 %vm2322_vm0, %v2321_v53 }
 0x3a7   :  { %2045 = vmatpush3.bf16.msra.mxu1 %v2044_v17 }
 0x3a8   :  { %2046 = vmatprep.subr.bf16.mxu1 %v2323_v5 }
 0x3ab   :  { %2048 = vmatpush3.bf16.msra.mxu1 %v2047_v32 }
 0x3ac   :  { %2049 = vmatprep.subr.bf16.mxu1 %v2323_v5 }
 0x3af   :  { %2051 = vmatpush3.bf16.msra.mxu1 %v2050_v24 }
 0x3b0   :  { %2052 = vmatprep.subr.bf16.mxu1 %v2323_v5 }
 0x3b3   :  { %2054 = vmatpush3.bf16.msra.mxu1 %v2053_v41 }
 0x3b4   :  { %2055 = vmatprep.subr.bf16.mxu1 %v2323_v5 }
 0x3b7   :  { %2057 = vmatpush3.bf16.msra.mxu1 %v2056_v30 }
 0x3b8   :  { %2058 = vmatprep.subr.bf16.mxu1 %v2323_v5 }
 0x3bb   :  { %2060 = vmatpush3.bf16.msra.mxu1 %v2059_v35 }
 0x3bc   :  { %2061 = vmatprep.subr.bf16.mxu1 %v2323_v5 }
 0x45c   :  { %v1841_v39 = vpop.f32.mrb[16].mxu0 }
 0x45d   :  { %v997_v40 = vadd.f32 %v1841_v39, %v2796_v38  ;;  %v991_v56 = vpop.f32.mrb[17].mxu0 }
 0x45e   :  { %v992_v63 = vadd.f32 %v2796_v38, %v991_v56 }
 0x45f   :  { %v1071_v18 = vmax.f32 %v997_v40, 0.0 }
 0x460   :  { %v1070_v27 = vmax.f32 %v992_v63, 0.0  ;;  %v1844_v47 = vpop.f32.mrb[18].mxu0 }
 0x461   :  { %v1007_v43 = vadd.f32 %v1844_v47, %v2796_v38  ;;  %v1001_v44 = vpop.f32.mrb[19].mxu0 }
 0x462   :  { %v2801_v42 = vpack.c.bf16 %v1071_v18, %v1070_v27  ;;  %v1002_v45 = vadd.f32 %v2796_v38, %v1001_v44 }
 0x463   :  { %v1073_v48 = vmax.f32 %v1007_v43, 0.0 }
 0x464   :  { %v1095_v3 = vunpack.c.l.bf16 %v2801_v42  ;;  %v1096_v49 = vunpack.c.h.bf16 %v2801_v42  ;;  %v1072_v7 = vmax.f32 %v1002_v45, 0.0  ;;  %v1847_v13 = vpop.f32.mrb[20].mxu0 }
 0x465   :  { %v1017_v31 = vadd.f32 %v1847_v13, %v2796_v38  ;;  %v1011_v36 = vpop.f32.mrb[21].mxu0 }
 0x466   :  { %v1111_v51 = vsub.f32 %v1070_v27, %v1095_v3  ;;  %v1112_v52 = vsub.f32 %v1071_v18, %v1096_v49  ;;  %v2807_v50 = vpack.c.bf16 %v1073_v48, %v1072_v7  ;;  %v1012_v60 = vadd.f32 %v2796_v38, %v1011_v36 }
 0x467   :  { %v1075_v55 = vmax.f32 %v1017_v31, 0.0 }
 0x468   :  { %v1127_v58 = vpack.c.bf16 %v1112_v52, %v1111_v51  ;;  %v1097_v57 = vunpack.c.l.bf16 %v2807_v50  ;;  %v1098_v59 = vunpack.c.h.bf16 %v2807_v50  ;;  %v1074_v14 = vmax.f32 %v1012_v60, 0.0  ;;  %v1850_v61 = vpop.f32.mrb[22].mxu0 }
 0x469   :  { %v1027_v12 = vadd.f32 %v1850_v61, %v2796_v38  ;;  %v1021_v21 = vpop.f32.mrb[23].mxu0 }
 0x46a   :  { %v1113_v62 = vsub.f32 %v1072_v7, %v1097_v57  ;;  %v1114_v22 = vsub.f32 %v1073_v48, %v1098_v59  ;;  %v2813_v0 = vpack.c.bf16 %v1075_v55, %v1074_v14  ;;  %v1022_v1 = vadd.f32 %v2796_v38, %v1021_v21  ;;  %1864 = vmatpush3.bf16.msra.mxu0 %v1127_v58 }
 0x46b   :  { %v1077_v33 = vmax.f32 %v1027_v12, 0.0  ;;  %1865 = vmatprep.subr.bf16.mxu0 %v2321_v53 }
 0x46c   :  { %v1128_v2 = vpack.c.bf16 %v1114_v22, %v1113_v62  ;;  %v1099_v29 = vunpack.c.l.bf16 %v2813_v0  ;;  %v1100_v46 = vunpack.c.h.bf16 %v2813_v0  ;;  %v1076_v4 = vmax.f32 %v1022_v1, 0.0  ;;  %v1853_v11 = vpop.f32.mrb[24].mxu0 }
 0x46d   :  { %v1037_v6 = vadd.f32 %v1853_v11, %v2796_v38  ;;  %v1031_v9 = vpop.f32.mrb[25].mxu0  ;;  %v1312_v11 = vld [vmem:[#allocation11 + $0x18] sm:$0xff] }
 0x46e   :  { %v1115_v15 = vsub.f32 %v1074_v14, %v1099_v29  ;;  %v1116_v10 = vsub.f32 %v1075_v55, %v1100_v46  ;;  %v2820_v16 = vpack.c.bf16 %v1077_v33, %v1076_v4  ;;  %v1032_v17 = vadd.f32 %v2796_v38, %v1031_v9  ;;  %1866 = vmatpush3.bf16.msra.mxu0 %v1128_v2  ;;  %v1086_v46 = vld [vmem:[%s2883_s2] sm:$0xf] }
 0x46f   :  { %v1079_v20 = vmax.f32 %v1037_v6, 0.0  ;;  %1867 = vmatprep.subr.bf16.mxu0 %v2321_v53 }
 0x470   :  { %v1129_v19 = vpack.c.bf16 %v1116_v10, %v1115_v15  ;;  %v1101_v32 = vunpack.c.l.bf16 %v2820_v16  ;;  %v1102_v23 = vunpack.c.h.bf16 %v2820_v16  ;;  %v1078_v37 = vmax.f32 %v1032_v17, 0.0  ;;  %v1856_v24 = vpop.f32.mrb[26].mxu0  ;;  %v1313_v17 = vld [vmem:[#allocation11 + $0x20] sm:$0xff] }
 0x471   :  { %v1047_v25 = vadd.f32 %v1856_v24, %v2796_v38  ;;  %v1041_v26 = vpop.f32.mrb[27].mxu0  ;;  %v1317_v24 = vld [vmem:[#allocation11 + $0x40] sm:$0xff] }
 0x472   :  { %v1117_v41 = vsub.f32 %v1076_v4, %v1101_v32  ;;  %v1118_v28 = vsub.f32 %v1077_v33, %v1102_v23  ;;  %v1091_v54 = vpack.c.bf16 %v1079_v20, %v1078_v37  ;;  %v1042_v30 = vadd.f32 %v2796_v38, %v1041_v26  ;;  %1868 = vmatpush3.bf16.msra.mxu0 %v1129_v19  ;;  %v1311_v4 = vld [vmem:[#allocation11 + $0x10] sm:$0xff]  ;;  %v1316_v23 = vld [vmem:[#allocation11 + $0x38] sm:$0xff] }
 0x473   :  { %v1081_v8 = vmax.f32 %v1047_v25, 0.0  ;;  %1869 = vmatprep.subr.bf16.mxu0 %v2321_v53  ;;  %v2065_v10 = vpack.c.bf16 %v1312_v11, %v1311_v4  ;;  %v1315_v32 = vld [vmem:[#allocation11 + $0x30] sm:$0xff]  ;;  %v1318_v25 = vld [vmem:[#allocation11 + $0x48] sm:$0xff] }
 0x474   :  { %v1130_v34 = vpack.c.bf16 %v1118_v28, %v1117_v41  ;;  %v1103_v35 = vunpack.c.l.bf16 %v1091_v54  ;;  %v1104_v39 = vunpack.c.h.bf16 %v1091_v54  ;;  %v1080_v40 = vmax.f32 %v1042_v30, 0.0  ;;  %v1859_v56 = vpop.f32.mrb[28].mxu0  ;;  %v1320_v41 = vld [vmem:[#allocation11 + $0x58] sm:$0xff]  ;;  %v1322_v30 = vld [vmem:[#allocation11 + $0x68] sm:$0xff] }
 0x475   :  { %v1057_v63 = vadd.f32 %v1859_v56, %v2796_v38  ;;  %v1051_v18 = vpop.f32.mrb[29].mxu0  ;;  %v2074_v26 = vpack.c.bf16 %v1318_v25, %v1317_v24 }
 0x476   :  { %v1119_v27 = vsub.f32 %v1078_v37, %v1103_v35  ;;  %v1120_v47 = vsub.f32 %v1079_v20, %v1104_v39  ;;  %v1092_v43 = vpack.c.bf16 %v1081_v8, %v1080_v40  ;;  %v1052_v44 = vadd.f32 %v2796_v38, %v1051_v18  ;;  %1870 = vmatpush3.bf16.msra.mxu0 %v1130_v34  ;;  %v1314_v20 = vld [vmem:[#allocation11 + $0x28] sm:$0xff]  ;;  %v1323_v34 = vld [vmem:[#allocation11 + $0x70] sm:$0xff]  ;;  %v1324_v35 = vld [vmem:[#allocation11 + $0x78] sm:$0xff] }
 0x477   :  { %v1083_v45 = vmax.f32 %v1057_v63, 0.0  ;;  %1871 = vmatprep.subr.bf16.mxu0 %v2321_v53  ;;  %v2068_v19 = vpack.c.bf16 %v1314_v20, %v1313_v17  ;;  %v2071_v37 = vpack.c.bf16 %v1316_v23, %v1315_v32  ;;  %v2083_v39 = vpack.c.bf16 %v1324_v35, %v1323_v34 }
 0x478   :  { %v1131_v48 = vpack.c.bf16 %v1120_v47, %v1119_v27  ;;  %v1105_v3 = vunpack.c.l.bf16 %v1092_v43  ;;  %v1106_v49 = vunpack.c.h.bf16 %v1092_v43  ;;  %v1082_v7 = vmax.f32 %v1052_v44, 0.0  ;;  %v1862_v13 = vpop.f32.mrb[30].mxu0  ;;  %v1442_v47 = vld [vmem:[%s2891_s10] ss:$0 sm:$0xff] }
 0x479   :  { %v1067_v31 = vadd.f32 %v1862_v13, %v2796_v38  ;;  %v1061_v36 = vpop.f32.mrb[31].mxu0 }
 0x47a   :  { %v1121_v51 = vsub.f32 %v1080_v40, %v1105_v3  ;;  %v1122_v52 = vsub.f32 %v1081_v8, %v1106_v49  ;;  %v1093_v60 = vpack.c.bf16 %v1083_v45, %v1082_v7  ;;  %v1062_v55 = vadd.f32 %v2796_v38, %v1061_v36  ;;  %1872 = vmatpush3.bf16.msra.mxu0 %v1131_v48  ;;  %v1441_v40 = vld [vmem:[%s2889_s8] ss:$0 sm:$0xff]  ;;  %s2324_s8 = smov [#allocation13]  }
 0x47b   :  { %v1085_v58 = vmax.f32 %v1067_v31, 0.0  ;;  %1873 = vmatprep.subr.bf16.mxu0 %v2321_v53  ;;  %s1419_s19 = sshll.u32 %s2324_s8, 4  ;;  %s1420_s19 = int_to_ptr.vmem [resolvable:$true] %s1419_s19 }
 0x47c   :  { %v1132_v57 = vpack.c.bf16 %v1122_v52, %v1121_v51  ;;  %v1107_v59 = vunpack.c.l.bf16 %v1093_v60  ;;  %v1108_v14 = vunpack.c.h.bf16 %v1093_v60  ;;  %v1084_v61 = vmax.f32 %v1062_v55, 0.0  ;;  %s2279_s10 = scalar_lea.vmem %s1420_s19, 128  ;;  %p2284_p7 = scmp.lt.s32.totalorder %s1420_s19, %s1420_s19 }
 0x47d   :  { %p2280_p6 = scmp.ne.s32.totalorder %s1420_s19, %s2279_s10  ;;  %p2285_p8 = scmp.lt.s32.totalorder %s2279_s10, %s2279_s10 }
 0x47e   :  { %v1123_v12 = vsub.f32 %v1082_v7, %v1107_v59  ;;  %v1124_v21 = vsub.f32 %v1083_v45, %v1108_v14  ;;  %v1094_v62 = vpack.c.bf16 %v1085_v58, %v1084_v61  ;;  %1874 = vmatpush3.bf16.msra.mxu0 %v1132_v57 }
 0x47f   :  { %1875 = vmatprep.subr.bf16.mxu0 %v2321_v53  ;;  %p2286_p9 = por %p2285_p8, %p2284_p7 }
 0x480   :  { %v1133_v22 = vpack.c.bf16 %v1124_v21, %v1123_v12  ;;  %v1109_v1 = vunpack.c.l.bf16 %v1094_v62  ;;  %v1110_v33 = vunpack.c.h.bf16 %v1094_v62 }
 0x481   :  { %p2287_p10 = pnand %p2286_p9, %p2280_p6 }
 0x482   :  { %v1125_v2 = vsub.f32 %v1084_v61, %v1109_v1  ;;  %v1126_v29 = vsub.f32 %v1085_v58, %v1110_v33  ;;  %1876 = vmatpush3.bf16.msra.mxu0 %v1133_v22 }
 0x483   :  { %1877 = vmatprep.subr.bf16.mxu0 %v2321_v53 }
 0x484   :  { %v1134_v38 = vpack.c.bf16 %v1126_v29, %v1125_v2 }
 0x486   :  { %1878 = vmatpush3.bf16.msra.mxu0 %v1134_v38 }
 0x487   :  { %1883 = vmatprep.subr.bf16.mxu0 %v2321_v53 }
 0x489   :  { %1880 = vmatmul.mubr.bf16.vlgmr.msra.gmra.mrb[32].mxu0 %v1086_v46 }
 0x48a   :  { %1884 = vmatpush3.bf16.msra.mxu0 %v2801_v42  ;;  %1899 = vmatprep.mubr.msk.bf16.mxu0 %vm2322_vm0, %v2321_v53  ;;  %v1309_v42 = vld [vmem:[#allocation11] sm:$0xff] }
 0x48b   :  { %1885 = vmatprep.subr.bf16.mxu0 %v2321_v53 }
 0x48e   :  { %1886 = vmatpush3.bf16.msra.mxu0 %v2807_v50  ;;  %v1310_v50 = vld [vmem:[#allocation11 + $0x8] sm:$0xff] }
 0x48f   :  { %1887 = vmatprep.subr.bf16.mxu0 %v2321_v53 }
 0x492   :  { %1888 = vmatpush3.bf16.msra.mxu0 %v2813_v0  ;;  %v2062_v0 = vpack.c.bf16 %v1310_v50, %v1309_v42 }
 0x493   :  { %1889 = vmatprep.subr.bf16.mxu0 %v2321_v53 }
 0x496   :  { %1890 = vmatpush3.bf16.msra.mxu0 %v2820_v16 }
 0x497   :  { %1891 = vmatprep.subr.bf16.mxu0 %v2321_v53 }
 0x49a   :  { %1892 = vmatpush3.bf16.msra.mxu0 %v1091_v54  ;;  %v1321_v54 = vld [vmem:[#allocation11 + $0x60] sm:$0xff] }
 0x49b   :  { %1893 = vmatprep.subr.bf16.mxu0 %v2321_v53  ;;  %v2080_v8 = vpack.c.bf16 %v1322_v30, %v1321_v54 }
 0x49e   :  { %1894 = vmatpush3.bf16.msra.mxu0 %v1092_v43 }
 0x49f   :  { %1895 = vmatprep.subr.bf16.mxu0 %v2321_v53 }
 0x4a2   :  { %1896 = vmatpush3.bf16.msra.mxu0 %v1093_v60 }
 0x4a3   :  { %1897 = vmatprep.subr.bf16.mxu0 %v2321_v53 }
 0x4a6   :  { %1898 = vmatpush3.bf16.msra.mxu0 %v1094_v62 }
 0x4a9   :  { %1900 = vmatmul.mubr.bf16.vlgmr.msra.gmra.mrb[32].mxu0 %v1086_v46 }
 0x57c   :  { %v1209_v6 = vpop.f32.mrb[32].mxu0 }
 0x57d   :  { %v1901_v9 = vpop.f32.mrb[33].mxu0  ;;  %1936 = vmatmul.mubr.f32.vlgmr.msra.gmra.mrb[32].mxu1 %v1209_v6 }
 0x57e   :  { %v1212_v15 = vpop.f32.mrb[34].mxu0  ;;  %2063 = vmatpush3.bf16.msra.mxu1 %v2062_v0  ;;  %1970 = vmatprep.mubr.msk.f32.mxu1 %vm2322_vm0, %v2321_v53  ;;  %v1319_v53 = vld [vmem:[#allocation11 + $0x50] sm:$0xff] }
 0x57f   :  { %v1902_v16 = vpop.f32.mrb[35].mxu0  ;;  %2064 = vmatprep.subr.bf16.mxu1 %v2323_v5  ;;  %v2077_v28 = vpack.c.bf16 %v1320_v41, %v1319_v53 }
 0x582   :  { %2066 = vmatpush3.bf16.msra.mxu1 %v2065_v10 }
 0x583   :  { %2067 = vmatprep.subr.bf16.mxu1 %v2323_v5 }
 0x586   :  { %2069 = vmatpush3.bf16.msra.mxu1 %v2068_v19 }
 0x587   :  { %2070 = vmatprep.subr.bf16.mxu1 %v2323_v5 }
 0x58a   :  { %2072 = vmatpush3.bf16.msra.mxu1 %v2071_v37 }
 0x58b   :  { %2073 = vmatprep.subr.bf16.mxu1 %v2323_v5 }
 0x58e   :  { %2075 = vmatpush3.bf16.msra.mxu1 %v2074_v26 }
 0x58f   :  { %2076 = vmatprep.subr.bf16.mxu1 %v2323_v5 }
 0x592   :  { %2078 = vmatpush3.bf16.msra.mxu1 %v2077_v28 }
 0x593   :  { %2079 = vmatprep.subr.bf16.mxu1 %v2323_v5 }
 0x596   :  { %2081 = vmatpush3.bf16.msra.mxu1 %v2080_v8 }
 0x597   :  { %2082 = vmatprep.subr.bf16.mxu1 %v2323_v5 }
 0x59a   :  { %2084 = vmatpush3.bf16.msra.mxu1 %v2083_v39 }
 0x650   :  { %v1304_v56 = vpop.f32.mrb[32].mxu1 }
 0x651   :  { %v1305_v63 = vadd.f32 %v1441_v40, %v1304_v56  ;;  %v1937_v18 = vpop.f32.mrb[33].mxu1 }
 0x653   :  { %v1308_v27 = vmax.f32 %v1305_v63, 0.0 }
 0x655   :  { %1971 = vmatmul.mubr.f32.vlgmr.msra.gmra.mrb[34].mxu1 %v1308_v27 }
 0x728   :  { %v1398_v43 = vpop.f32.mrb[34].mxu1 }
 0x729   :  { %v1399_v44 = vadd.f32 %v1442_v47, %v1398_v43  ;;  %v1972_v5 = vpop.f32.mrb[35].mxu1 }
 0x72b   :  { %1402 = vmax.xlane.f32.xlu0 %v1399_v44 }
 0x7b8   :  { %v1403_v45 = vpop.xlane.xlu0 %1402 }
 0x7b9   :  { %v1404_v48 = vsub.f32 %v1399_v44, %v1403_v45 }
 0x7bb   :  { %v1405_v3 = vmul.f32 1.442695, %v1404_v48 }
 0x7bd   :  { %2143 = vpow2.f32 %v1405_v3 }
 0x7c7   :  { %v2144_v49 = vpop.eup %2143 }
 0x7c8   :  { %1407 = vadd.xlane.f32.xlu0 %v2144_v49 }
 0x855   :  { %v1408_v7 = vpop.xlane.xlu0 %1407 }
 0x856   :  { %2145 = vlog2.f32 %v1408_v7 }
 0x860   :  { %v2146_v13 = vpop.eup %2145 }
 0x861   :  { %v1410_v31 = vmul.f32 0.6931472, %v2146_v13 }
 0x863   :  { %v1411_v36 = vsub.f32 %v1404_v48, %v1410_v31 }
 0x865   :  { %1412 = vst [vmem:[#allocation13] sm:$0xff] %v1411_v36 }
 0x866   :  { %2290 = shalt.err (!%p2287_p10)
}
 0x867   :  { %s2291_s23 = scalar_lea.hbm %s2892_s11, 128 }
 0x868   :  { %p2292_p11 = scmp.ne.s32.totalorder %s2892_s11, %s2291_s23  ;;  %p2295_p12 = scmp.lt.u32.totalorder %s2291_s23, %s2892_s11 }
 0x86a   :  { %p2297_p13 = pnand %p2295_p12, %p2292_p11 }
 0x86c   :  { %2300 = shalt.err (!%p2297_p13)
}
 0x86d   :  { %1422 = dma.vmem_to_hbm [thread:$0]  %s1420_s19, 128, %s2892_s11, [#allocation4]  }
 0x86e   :  { %2309 = dma.done.wait [#allocation4], 128  }
 0x86f   :  { %2310 = vsyncadd [#allocation4], 4294967168 }
 0x870   :  { %1426 = vsyncpa [#allocation3], 1 }
 0x871   :  { %1427 = vsyncpa [#allocation6], 1 }
 0x872   :  { %1428 = vsyncpa [#allocation9], 1 }
 0x873   :  { %1429 = vsyncpa [#allocation12], 1 }
 0x874   :  { %1430 = vsyncpa [#allocation4], 1 }

</bundles_post_ra>
